<compile_context>
chip_gen: v6e
topology: v6e:2x2x1
jax: 0.10.0
libtpu: 0.0.40
codegen_flags: <defaults>
</compile_context>

<pallas_src>
import math

import jax
import jax.numpy as jnp
from jax.experimental import pallas as pl
from jax.experimental.pallas import tpu as pltpu

GAMMA = 2.0   # module default; statically folded into an explicit square (m*m)
ALPHA = 0.25
LANES = 128
SUBLANES = 8
ROW_TILE_TARGET = 4096   # rows per grid step: 4096*128*4B = 2 MiB per f32 input tile
CHUNK_ROWS_TARGET = 64   # rows per register-resident inner chunk (8 f32 vregs/array)


def _make_kernel(row_tile, chunk_rows, num_chunks, valid_rows, unroll,
                 assume_binary_targets):
    """Build the per-tile kernel.  All shape parameters are Python ints."""

    def kernel(yp_ref, yt_ref, out_ref):
        # Rows of this tile holding real (or harmless zero-padded) data.  Rows
        # beyond that belong to an out-of-bounds boundary block (undefined
        # VMEM contents) and are masked out below.
        tile_valid = valid_rows - pl.program_id(0) * row_tile
        # Hoisted once (broadcasts are not CSE'd if re-emitted per chunk).
        row_iota = jax.lax.broadcasted_iota(jnp.int32, (chunk_rows, LANES), 0)

        def chunk_body(c, acc):
            start = pl.multiple_of(c * chunk_rows, chunk_rows)
            p = yp_ref[pl.ds(start, chunk_rows), :].astype(jnp.float32)
            y = yt_ref[pl.ds(start, chunk_rows), :].astype(jnp.float32)

            if assume_binary_targets:
                # y strictly in {0, 1}: one log + two selects.
                is_pos = y > 0.5
                p_t = jnp.where(is_pos, p, 1.0 - p)
                ce = -jnp.maximum(jnp.log(p_t), -100.0)
                alpha_w = jnp.where(is_pos, ALPHA, 1.0 - ALPHA)
            else:
                # General soft-label form (matches the module's math exactly).
                one_minus_p = 1.0 - p
                one_minus_y = 1.0 - y
                # BCE with PyTorch's clamp(log(x), min=-100), reduction='none'.
                log_p = jnp.maximum(jnp.log(p), -100.0)
                log_1mp = jnp.maximum(jnp.log(one_minus_p), -100.0)
                ce = -(y * log_p + one_minus_y * log_1mp)
                p_t = y * p + one_minus_y * one_minus_p
                alpha_w = y * ALPHA + one_minus_y * (1.0 - ALPHA)

            # gamma == 2 -> explicit square: one VPU mul, NaN-safe.
            m = 1.0 - p_t
            focal = (m * m) * alpha_w * ce

            # Mask rows past the end of the input (boundary block of the last
            # grid step).  jnp.where is a select, so garbage/NaN in the
            # unselected branch never reaches the accumulator.
            mask = row_iota < (tile_valid - c * chunk_rows)
            focal = jnp.where(mask, focal, 0.0)

            # (chunk,128) -> (chunk/8, 8, 128), sum leading axis: pure
            # whole-vreg VPU adds (split is on a sublane boundary, no XLU).
            partial = focal.reshape(chunk_rows // SUBLANES, SUBLANES, LANES).sum(axis=0)
            return acc + partial

        acc = jax.lax.fori_loop(
            0, num_chunks, chunk_body,
            jnp.zeros((SUBLANES, LANES), jnp.float32),
            unroll=unroll)
        out_ref[...] = acc  # (8,128) lane-dense, unmasked store

    return kernel


def focal_loss2(y_pred, y_true, *, assume_binary_targets=False):
    """Mean focal loss over all elements; returns a scalar f32."""
    assert y_pred.shape == y_true.shape
    total = y_pred.size  # true element count (mean divisor)

    yp = y_pred.reshape(-1)
    yt = y_true.reshape(-1)

    # Single small pad to a multiple of 8*128 with (p=0, y=0), which
    # contributes exactly zero loss (<= 1023 elements; usually a no-op).
    base = SUBLANES * LANES
    padded = pl.cdiv(total, base) * base
    if padded != total:
        yp = jnp.pad(yp, (0, padded - total))
        yt = jnp.pad(yt, (0, padded - total))

    rows = padded // LANES                   # multiple of 8
    row_tile = min(ROW_TILE_TARGET, rows)    # multiple of 8
    num_tiles = pl.cdiv(rows, row_tile)      # last block may overrun -> masked

    chunk_rows = math.gcd(row_tile, CHUNK_ROWS_TARGET)
    num_chunks = row_tile // chunk_rows
    # Full unroll for short loops; otherwise a safe divisor-of-trip-count unroll.
    unroll = num_chunks if num_chunks <= 8 else math.gcd(num_chunks, 8)

    yp2d = yp.reshape(rows, LANES)
    yt2d = yt.reshape(rows, LANES)

    kernel = _make_kernel(row_tile, chunk_rows, num_chunks, rows, unroll,
                          assume_binary_targets)

    partials = pl.pallas_call(
        kernel,
        out_shape=jax.ShapeDtypeStruct((num_tiles, SUBLANES, LANES), jnp.float32),
        grid_spec=pltpu.PrefetchScalarGridSpec(
            num_scalar_prefetch=0,
            grid=(num_tiles,),
            in_specs=[
                pl.BlockSpec((row_tile, LANES), lambda i: (i, 0)),
                pl.BlockSpec((row_tile, LANES), lambda i: (i, 0)),
            ],
            # Leading dim squeezed -> kernel sees an (8,128) output block.
            out_specs=pl.BlockSpec((None, SUBLANES, LANES), lambda i: (i, 0, 0)),
        ),
        compiler_params=pltpu.CompilerParams(
            dimension_semantics=("parallel",),
            vmem_limit_bytes=32 * 1024 * 1024,
        ),
    )(yp2d, yt2d)

    # Tiny final reduce + mean divide in XLA (divisor = unpadded count).
    return jnp.sum(partials) / total


def _reference(y_pred, y_true, gamma=GAMMA, alpha=ALPHA):
    p = y_pred.astype(jnp.float32)
    y = y_true.astype(jnp.float32)
    ce = -(y * jnp.maximum(jnp.log(p), -100.0)
           + (1.0 - y) * jnp.maximum(jnp.log(1.0 - p), -100.0))
    p_t = y * p + (1.0 - y) * (1.0 - p)
    mod = (1.0 - p_t) ** gamma
    aw = y * alpha + (1.0 - y) * (1.0 - alpha)
    return jnp.mean(mod * aw * ce)


if __name__ == "__main__":
    key = jax.random.PRNGKey(0)
    k1, k2, k3, k4 = jax.random.split(key, 4)

    # NCHW probability maps (e.g. sigmoid outputs) and binary targets.
    shape = (2, 4, 16, 16)  # 2048 elements = 16 rows of 128 lanes
    y_pred = jax.nn.sigmoid(jax.random.normal(k1, shape, dtype=jnp.float32))
    y_true = (jax.random.uniform(k2, shape) > 0.5).astype(jnp.float32)

    loss = jax.block_until_ready(focal_loss2(y_pred, y_true))
    ref = jax.block_until_ready(_reference(y_pred, y_true))
    assert jnp.allclose(loss, ref, rtol=1e-5, atol=1e-6), (loss, ref)

    # Non-tile-aligned element count + soft labels: exercises the single small
    # zero-pad path and the general (two-log) form.
    shape2 = (3, 5, 7, 11)  # 1155 elements (not a multiple of 1024)
    y_pred2 = jax.nn.sigmoid(jax.random.normal(k3, shape2, dtype=jnp.float32))
    y_true2 = jax.random.uniform(k4, shape2, dtype=jnp.float32)  # soft labels
    loss2 = jax.block_until_ready(focal_loss2(y_pred2, y_true2))
    ref2 = jax.block_until_ready(_reference(y_pred2, y_true2))
    assert jnp.allclose(loss2, ref2, rtol=1e-5, atol=1e-6), (loss2, ref2)

    print("KERNEL_OK")
</pallas_src>

<mosaic_0001>
module attributes {stable_mosaic.version = 11 : i64} {
  func.func @kernel(%arg0: i32, %arg1: memref<16x128xf32, #tpu.memory_space<vmem>>, %arg2: memref<16x128xf32, #tpu.memory_space<vmem>>, %arg3: memref<1x8x128xf32, #tpu.memory_space<vmem>>) attributes {dimension_semantics = [#tpu.dimension_semantics<parallel>], iteration_bounds = array<i64: 1>, scalar_prefetch = 0 : i64, scratch_operands = 0 : i64, tpu.core_type = #tpu.core_type<tc>, window_params = [{transform_indices = @transform_0, window_bounds = array<i64: 16, 128>}, {transform_indices = @transform_1, window_bounds = array<i64: 16, 128>}, {transform_indices = @transform_2, window_bounds = array<i64: 1, 8, 128>}]} {
    %c16_i32 = arith.constant 16 : i32
    %0 = arith.muli %arg0, %c16_i32 : i32
    %c16_i32_0 = arith.constant 16 : i32
    %1 = arith.subi %c16_i32_0, %0 : i32
    %2 = tpu.iota {dimensions = array<i32: 0>} : vector<16x128xi32>
    %cst = arith.constant 0.000000e+00 : f32
    %3 = vector.broadcast %cst : f32 to vector<8x128xf32>
    %c0_i32 = arith.constant 0 : i32
    %c16_i32_1 = arith.constant 16 : i32
    %4 = arith.muli %c0_i32, %c16_i32_1 : i32
    %5 = tpu.assume_multiple %4, 16 : i32
    %6 = arith.index_cast %5 : i32 to index
    %c0 = arith.constant 0 : index
    %7 = vector.load %arg1[%6, %c0] : memref<16x128xf32, #tpu.memory_space<vmem>>, vector<16x128xf32>
    %8 = arith.index_cast %5 : i32 to index
    %c0_2 = arith.constant 0 : index
    %9 = vector.load %arg2[%8, %c0_2] : memref<16x128xf32, #tpu.memory_space<vmem>>, vector<16x128xf32>
    %cst_3 = arith.constant 1.000000e+00 : f32
    %10 = vector.broadcast %cst_3 : f32 to vector<16x128xf32>
    %11 = arith.subf %10, %7 : vector<16x128xf32>
    %cst_4 = arith.constant 1.000000e+00 : f32
    %12 = vector.broadcast %cst_4 : f32 to vector<16x128xf32>
    %13 = arith.subf %12, %9 : vector<16x128xf32>
    %14 = math.log %7 : vector<16x128xf32>
    %cst_5 = arith.constant -1.000000e+02 : f32
    %15 = vector.broadcast %cst_5 : f32 to vector<16x128xf32>
    %16 = arith.maximumf %14, %15 : vector<16x128xf32>
    %17 = math.log %11 : vector<16x128xf32>
    %cst_6 = arith.constant -1.000000e+02 : f32
    %18 = vector.broadcast %cst_6 : f32 to vector<16x128xf32>
    %19 = arith.maximumf %17, %18 : vector<16x128xf32>
    %20 = arith.mulf %9, %16 : vector<16x128xf32>
    %21 = arith.mulf %13, %19 : vector<16x128xf32>
    %22 = arith.addf %20, %21 : vector<16x128xf32>
    %cst_7 = arith.constant 0.000000e+00 : f32
    %23 = vector.broadcast %cst_7 : f32 to vector<16x128xf32>
    %24 = arith.subf %23, %22 : vector<16x128xf32>
    %25 = arith.mulf %9, %7 : vector<16x128xf32>
    %26 = arith.mulf %13, %11 : vector<16x128xf32>
    %27 = arith.addf %25, %26 : vector<16x128xf32>
    %cst_8 = arith.constant 2.500000e-01 : f32
    %28 = vector.broadcast %cst_8 : f32 to vector<16x128xf32>
    %29 = arith.mulf %9, %28 : vector<16x128xf32>
    %cst_9 = arith.constant 7.500000e-01 : f32
    %30 = vector.broadcast %cst_9 : f32 to vector<16x128xf32>
    %31 = arith.mulf %13, %30 : vector<16x128xf32>
    %32 = arith.addf %29, %31 : vector<16x128xf32>
    %cst_10 = arith.constant 1.000000e+00 : f32
    %33 = vector.broadcast %cst_10 : f32 to vector<16x128xf32>
    %34 = arith.subf %33, %27 : vector<16x128xf32>
    %35 = arith.mulf %34, %34 : vector<16x128xf32>
    %36 = arith.mulf %35, %32 : vector<16x128xf32>
    %37 = arith.mulf %36, %24 : vector<16x128xf32>
    %c16_i32_11 = arith.constant 16 : i32
    %38 = arith.muli %c0_i32, %c16_i32_11 : i32
    %39 = arith.subi %1, %38 : i32
    %40 = vector.broadcast %39 : i32 to vector<16x128xi32>
    %41 = arith.cmpi slt, %2, %40 : vector<16x128xi32>
    %cst_12 = arith.constant 0.000000e+00 : f32
    %42 = vector.broadcast %cst_12 : f32 to vector<16x128xf32>
    %43 = arith.select %41, %37, %42 : vector<16x128xi1>, vector<16x128xf32>
    %44 = vector.shape_cast %43 : vector<16x128xf32> to vector<2x8x128xf32>
    %cst_13 = arith.constant dense<0.000000e+00> : vector<8x128xf32>
    %45 = vector.multi_reduction <add>, %44, %cst_13 [0] : vector<2x8x128xf32> to vector<8x128xf32>
    %46 = arith.addf %3, %45 : vector<8x128xf32>
    %c1_i32 = arith.constant 1 : i32
    %c0_14 = arith.constant 0 : index
    %c0_15 = arith.constant 0 : index
    %c0_16 = arith.constant 0 : index
    %47 = vector.load %arg3[%c0_14, %c0_15, %c0_16] : memref<1x8x128xf32, #tpu.memory_space<vmem>>, vector<1x8x128xf32>
    %48 = vector.shape_cast %47 : vector<1x8x128xf32> to vector<8x128xf32>
    %49 = vector.shape_cast %46 : vector<8x128xf32> to vector<1x8x128xf32>
    tpu.vector_store %arg3[%c0_14, %c0_15, %c0_16], %49 {strides = array<i32>} : memref<1x8x128xf32, #tpu.memory_space<vmem>>, vector<1x8x128xf32>,
    return
  }
  func.func @transform_0(%arg0: i32) -> (i32, i32) {
    %c0_i32 = arith.constant 0 : i32
    %c0_i32_0 = arith.constant 0 : i32
    return %arg0, %c0_i32 : i32, i32
  }
  func.func @transform_1(%arg0: i32) -> (i32, i32) {
    %c0_i32 = arith.constant 0 : i32
    %c0_i32_0 = arith.constant 0 : i32
    return %arg0, %c0_i32 : i32, i32
  }
  func.func @transform_2(%arg0: i32) -> (i32, i32, i32) {
    %c0_i32 = arith.constant 0 : i32
    %c0_i32_0 = arith.constant 0 : i32
    %c0_i32_1 = arith.constant 0 : i32
    return %arg0, %c0_i32, %c0_i32_0 : i32, i32, i32
  }
}

</mosaic_0001>

<bundles_post_ra>
// kernel: tpu_custom_call.1
= control target key start
LH: loop header
LB: loop body
LE: loop exit
PB: predicated region body
PF: predicated region fallthrough
CT: control target
= control target key end

     0   :  { %7 = vsyncpa [#allocation3], 0  ;;  %s225_s0 = inlined_call_operand.hbm [shape: f32[16,128], index: 0, kind: input, shape index: {}]   ;;  %s226_s1 = inlined_call_operand.hbm [shape: f32[16,128], index: 1, kind: input, shape index: {}]   ;;  %s227_s2 = inlined_call_operand.hbm [shape: f32[1,8,128], index: 2, kind: output, shape index: {}]  }
   0x1   :  { %8 = vsyncpa [#allocation6], 0 }
   0x2   :  { %9 = vsyncpa [#allocation4], 0  ;;  %s196_s9 = smov [#allocation2]  }
   0x3   :  { %s15_s10 = sshll.u32 %s196_s9, 4  ;;  %s16_s10 = int_to_ptr.vmem [resolvable:$true] %s15_s10 }
   0x4   :  { %s138_s11 = scalar_lea.vmem %s16_s10, 256  ;;  %p143_p1 = scmp.lt.s32.totalorder %s16_s10, %s16_s10 }
   0x5   :  { %p139_p0 = scmp.ne.s32.totalorder %s16_s10, %s138_s11  ;;  %p144_p2 = scmp.lt.s32.totalorder %s138_s11, %s138_s11 }
   0x7   :  { %p145_p3 = por %p144_p2, %p143_p1 }
   0x9   :  { %p146_p4 = pnand %p145_p3, %p139_p0 }
   0xb   :  { %149 = shalt.err (!%p146_p4)
}
   0xc   :  { %s197_s12 = smov 128   ;;  %s198_s13 = smov 8  }
   0xd   :  { %21 = dma.hbm_to_vmem [thread:$0]  %s225_s0, 256, %s16_s10, [#allocation3], %s197_s12, %s197_s12, %s198_s13  }
   0xe   :  { %s199_s16 = smov [#allocation5]  }
   0xf   :  { %s27_s17 = sshll.u32 %s199_s16, 4  ;;  %s28_s17 = int_to_ptr.vmem [resolvable:$true] %s27_s17 }
  0x10   :  { %s158_s18 = scalar_lea.vmem %s28_s17, 256  ;;  %p163_p6 = scmp.lt.s32.totalorder %s28_s17, %s28_s17 }
  0x11   :  { %p159_p5 = scmp.ne.s32.totalorder %s28_s17, %s158_s18  ;;  %p164_p7 = scmp.lt.s32.totalorder %s158_s18, %s158_s18 }
  0x13   :  { %p165_p8 = por %p164_p7, %p163_p6 }
  0x15   :  { %p166_p9 = pnand %p165_p8, %p159_p5 }
  0x17   :  { %169 = shalt.err (!%p166_p9)
}
  0x18   :  { %33 = dma.hbm_to_vmem [thread:$0]  %s226_s1, 256, %s28_s17, [#allocation6], %s197_s12, %s197_s12, %s198_s13  }
  0x19   :  { %190 = dma.done.wait [#allocation3], 256  }
  0x1a   :  { %191 = vsyncadd [#allocation3], 4294967040 }
  0x1b   :  { %192 = dma.done.wait [#allocation6], 256  }
  0x1c   :  { %193 = vsyncadd [#allocation6], 4294967040  ;;  %v45_v0 = vld [vmem:[#allocation2] sm:$0xff]  ;;  %v46_v1 = vld [vmem:[#allocation2 + $0x8] sm:$0xff]  ;;  %s200_s0 = smov [#allocation7]  }
  0x1d   :  { %v47_v2 = vld [vmem:[#allocation5] sm:$0xff]  ;;  %v48_v3 = vld [vmem:[#allocation5 + $0x8] sm:$0xff]  ;;  %v49_v4 = vsub.f32 1.0, %v45_v0  ;;  %v50_v5 = vsub.f32 1.0, %v46_v1  ;;  %122 = vlog2.f32 %v45_v0  ;;  %s107_s1 = sshll.u32 %s200_s0, 4  ;;  %s108_s1 = int_to_ptr.vmem [resolvable:$true] %s107_s1 }
  0x1e   :  { %124 = vlog2.f32 %v46_v1  ;;  %v51_v6 = vsub.f32 1.0, %v47_v2  ;;  %v52_v7 = vsub.f32 1.0, %v48_v3  ;;  %v73_v8 = vmul.f32 %v47_v2, %v45_v0  ;;  %s170_s21 = scalar_lea.vmem %s108_s1, 128  ;;  %p175_p11 = scmp.lt.s32.totalorder %s108_s1, %s108_s1 }
  0x1f   :  { %126 = vlog2.f32 %v49_v4  ;;  %v74_v10 = vmul.f32 %v48_v3, %v46_v1  ;;  %v79_v17 = vmul.f32 0.25, %v47_v2  ;;  %v80_v22 = vmul.f32 0.25, %v48_v3  ;;  %p171_p10 = scmp.ne.s32.totalorder %s108_s1, %s170_s21  ;;  %p176_p12 = scmp.lt.s32.totalorder %s170_s21, %s170_s21 }
  0x20   :  { %128 = vlog2.f32 %v50_v5  ;;  %v75_v9 = vmul.f32 %v51_v6, %v49_v4  ;;  %v76_v11 = vmul.f32 %v52_v7, %v50_v5  ;;  %v81_v18 = vmul.f32 0.75, %v51_v6 }
  0x21   :  { %v82_v23 = vmul.f32 0.75, %v52_v7  ;;  %p177_p13 = por %p176_p12, %p175_p11 }
  0x22   :  { %v77_v12 = vadd.f32 %v75_v9, %v73_v8  ;;  %v78_v13 = vadd.f32 %v76_v11, %v74_v10  ;;  %v83_v32 = vadd.f32 %v81_v18, %v79_v17 }
  0x23   :  { %v84_v36 = vadd.f32 %v82_v23, %v80_v22  ;;  %p178_p0 = pnand %p177_p13, %p171_p10 }
  0x24   :  { %v85_v19 = vsub.f32 1.0, %v77_v12  ;;  %v86_v24 = vsub.f32 1.0, %v78_v13 }
  0x26   :  { %v87_v33 = vmul.f32 %v85_v19, %v85_v19  ;;  %v88_v37 = vmul.f32 %v86_v24, %v86_v24 }
  0x28   :  { %v89_v41 = vmul.f32 %v87_v33, %v83_v32  ;;  %v90_v43 = vmul.f32 %v88_v37, %v84_v36 }
  0x2a   :  { %v123_v14 = vpop.eup %122 }
  0x2b   :  { %v125_v15 = vpop.eup %124  ;;  %v54_v16 = vmul.f32 0.6931472, %v123_v14 }
  0x2c   :  { %v127_v20 = vpop.eup %126  ;;  %v56_v21 = vmul.f32 0.6931472, %v125_v15 }
  0x2d   :  { %v129_v25 = vpop.eup %128  ;;  %v57_v26 = vmax.f32 %v54_v16, -100.0  ;;  %v60_v27 = vmul.f32 0.6931472, %v127_v20 }
  0x2e   :  { %v58_v28 = vmax.f32 %v56_v21, -100.0  ;;  %v62_v29 = vmul.f32 0.6931472, %v129_v25 }
  0x2f   :  { %v63_v30 = vmax.f32 %v60_v27, -100.0  ;;  %v65_v31 = vmul.f32 %v57_v26, %v47_v2 }
  0x30   :  { %v64_v34 = vmax.f32 %v62_v29, -100.0  ;;  %v66_v35 = vmul.f32 %v58_v28, %v48_v3 }
  0x31   :  { %v67_v38 = vmul.f32 %v63_v30, %v51_v6 }
  0x32   :  { %v68_v39 = vmul.f32 %v64_v34, %v52_v7 }
  0x33   :  { %v69_v40 = vadd.f32 %v67_v38, %v65_v31 }
  0x34   :  { %v70_v42 = vadd.f32 %v68_v39, %v66_v35 }
  0x35   :  { %v71_v44 = vsub.f32 0.0, %v69_v40 }
  0x36   :  { %v72_v45 = vsub.f32 0.0, %v70_v42 }
  0x37   :  { %v91_v46 = vmul.f32 %v89_v41, %v71_v44 }
  0x38   :  { %v92_v47 = vmul.f32 %v90_v43, %v72_v45 }
  0x3a   :  { %v98_v48 = vadd.f32 %v92_v47, %v91_v46 }
  0x3c   :  { %100 = vst [vmem:[#allocation7] sm:$0xff] %v98_v48 }
  0x3d   :  { %181 = shalt.err (!%p178_p0)
}
  0x3e   :  { %110 = dma.vmem_to_hbm [thread:$0]  %s108_s1, 128, %s227_s2, [#allocation4]  }
  0x3f   :  { %194 = dma.done.wait [#allocation4], 128  }
  0x40   :  { %195 = vsyncadd [#allocation4], 4294967168 }
  0x41   :  { %114 = vsyncpa [#allocation3], 1 }
  0x42   :  { %115 = vsyncpa [#allocation6], 1 }
  0x43   :  { %116 = vsyncpa [#allocation4], 1 }

</bundles_post_ra>
